<compile_context>
chip_gen: v7x
topology: tpu7x:2x2x1
jax: 0.10.0
libtpu: 0.0.40
codegen_flags: <defaults>
</compile_context>

<pallas_src>
import functools

import numpy as np
import jax
import jax.numpy as jnp
from jax.experimental import pallas as pl
from jax.experimental.pallas import tpu as pltpu

# ---------------- hyper-parameters (small, consistent with the module) -------------
IN_FEATS  = 16
HIDDEN    = 32
OUT_FEATS = 8
NUM_HOPS  = 3
NUM_HEADS = 2
N_NODES   = 8
NEG_SLOPE = 0.2
BN_EPS    = 1e-5

HC  = NUM_HEADS * HIDDEN            # 64  : per-hop (head, channel) lanes
KHC = NUM_HOPS * HC                 # 192 : hop-packed lanes
KH  = NUM_HEADS * NUM_HOPS          # 6   : attention columns, ordered (head-major) h*K + k
KIN = NUM_HOPS * IN_FEATS           # 48  : hop-packed input lanes


# ---------------- fused SAGN forward kernel ----------------------------------------
def _sagn_fused_kernel(x_ref, w48_ref, w192_ref, w6_ref, bias_ref, out_ref,
                       *, kh, negative_slope):
    f32 = jnp.float32
    B = bias_ref[...]                                    # (8, KHC) f32 bias rows
    xb = x_ref[...].astype(jnp.bfloat16)                 # (N, K*IN)

    def bdot(lhs, rhs_bf16):                             # bf16 MXU dot, f32 accumulate
        return jnp.dot(lhs.astype(jnp.bfloat16), rhs_bf16,
                       preferred_element_type=f32)

    # (1) hop-packed encoder layer 0 (encoder-internal eval-BN folded) + ReLU
    h0 = jnp.maximum(bdot(xb, w48_ref[0]) + B[0:1, :], 0.0)          # (N, KHC)
    # (2) res_fc on hop-0 features (SAGN-BN scale folded); lives in the hop-0 lane block
    res = bdot(xb, w48_ref[1])                                        # (N, KHC)
    # (3) encoder layer 1 (SAGN-BN scale folded into output columns)
    hid = bdot(h0, w192_ref[0]) + B[1:2, :]                           # (N, KHC)

    # (4) hop attention (focal='first'): one dot against packed A_l + A_r(broadcast over hops)
    e = bdot(hid, w192_ref[1])[:, 0:kh]                               # (N, KH)
    e = jnp.where(e >= 0, e, negative_slope * e)                      # LeakyReLU
    # NOTE: row-global max is a valid softmax shift (each head group normalizes
    # independently); per-group max is only needed if score spreads exceed ~80.
    m = jnp.max(e, axis=-1, keepdims=True)
    p = jnp.exp(e - m)                                                # f32
    G = w6_ref[0][0:kh, 0:kh].astype(f32)                             # per-head ones blocks (exact)
    denom = jnp.dot(p, G, preferred_element_type=f32)                 # per-head hop sums
    a = p * (1.0 / denom)                                             # softmax over hops, (N, KH)

    # (5) broadcast a to hid lanes (E) and contract the hop blocks (S);
    #     the residual rides the same contraction via the hop-0 block.
    E = w6_ref[1][0:kh, :].astype(f32)                                # (KH, KHC) 0/1 (exact)
    w = jnp.dot(a, E, preferred_element_type=f32)                     # (N, KHC)
    comb = bdot(hid * w + res, w192_ref[2]) + B[2:3, :]               # lanes 0:HC live
    out = jnp.maximum(comb, 0.0)                                      # SAGN BN shift + ReLU

    # (6) post GroupMLP: per-head block-diagonal, internal BN folded, head-mean folded
    h2 = jnp.maximum(bdot(out, w192_ref[3]) + B[3:4, :], 0.0)         # lanes 0:HC live
    z = bdot(h2, w192_ref[4])                                         # lanes 0:OUT live

    # (7) attention head-mean placed in lanes [OUT, OUT+K) via a tiny exact f32 dot
    AM = w6_ref[2][0:kh, :].astype(f32)                               # (KH, KHC), 0.5 entries (exact)
    amean = jnp.dot(a, AM, preferred_element_type=f32)                # lanes OUT:OUT+K live

    # single lane-dense output block: [out | a-head-means | zeros]
    out_ref[...] = z + amean + B[4:5, :]


def sagn_forward(feats_stacked, pp):
    """feats_stacked: (K, N, IN_FEATS); pp: packed params -> (out (N,O), a (N,1,K))."""
    K, N, F = feats_stacked.shape
    x48 = jnp.transpose(feats_stacked, (1, 0, 2)).reshape(N, K * F)   # hop-packed lanes
    kern = functools.partial(_sagn_fused_kernel, kh=KH, negative_slope=NEG_SLOPE)

    flops = 2 * N * (2 * KIN * KHC + 5 * KHC * KHC + KH * KH + 2 * KH * KHC)
    bytes_accessed = (x48.size * 4 + pp["w48"].size * 2 + pp["w192"].size * 2
                      + pp["w6"].size * 2 + pp["bias"].size * 4 + N * KHC * 4)

    y = pl.pallas_call(
        kern,
        out_shape=jax.ShapeDtypeStruct((N, KHC), jnp.float32),
        in_specs=[pl.BlockSpec(memory_space=pltpu.MemorySpace.VMEM)] * 5,
        out_specs=pl.BlockSpec(memory_space=pltpu.MemorySpace.VMEM),
        cost_estimate=pl.CostEstimate(flops=flops, transcendentals=N * KH,
                                      bytes_accessed=bytes_accessed),
    )(x48, pp["w48"], pp["w192"], pp["w6"], pp["bias"])

    out = y[:, :OUT_FEATS]
    a = y[:, OUT_FEATS:OUT_FEATS + K].reshape(N, 1, K)
    return out, a


# ---------------- parameter initialization (deterministic, synthetic) ---------------
def _xavier(key, shape, gain=1.4142135):
    fan_in, fan_out = shape[-2], shape[-1]
    bound = gain * (6.0 / (fan_in + fan_out)) ** 0.5
    return jax.random.uniform(key, shape, jnp.float32, -bound, bound)


def _init_group_mlp(key, din, dh, dout, heads):
    k = jax.random.split(key, 6)
    return dict(
        W0=_xavier(k[0], (heads, din, dh)),
        b0=0.02 * jax.random.normal(k[4], (heads, dh), jnp.float32),
        bn_gamma=1.0 + 0.05 * jax.random.normal(k[2], (heads, dh), jnp.float32),
        bn_beta=0.05 * jax.random.normal(k[3], (heads, dh), jnp.float32),
        bn_rm=jnp.zeros((heads, dh), jnp.float32),        # eval running mean
        bn_rv=jnp.ones((heads, dh), jnp.float32),         # eval running var
        W1=_xavier(k[1], (heads, dh, dout)),
        b1=0.02 * jax.random.normal(k[5], (heads, dout), jnp.float32),
    )


def init_params(key):
    keys = jax.random.split(key, NUM_HOPS + 6)
    enc = [_init_group_mlp(keys[i], IN_FEATS, HIDDEN, HIDDEN, NUM_HEADS)
           for i in range(NUM_HOPS)]
    post = _init_group_mlp(keys[NUM_HOPS], HIDDEN, HIDDEN, OUT_FEATS, NUM_HEADS)
    return dict(
        enc=enc, post=post,
        res_W=_xavier(keys[NUM_HOPS + 1], (IN_FEATS, NUM_HEADS * HIDDEN)),  # no bias
        attn_l=0.3 * jax.random.normal(keys[NUM_HOPS + 2],
                                       (NUM_HEADS, HIDDEN), jnp.float32),
        attn_r=0.3 * jax.random.normal(keys[NUM_HOPS + 5],
                                       (NUM_HEADS, HIDDEN), jnp.float32),
        bn_gamma=1.0 + 0.05 * jax.random.normal(keys[NUM_HOPS + 3],
                                                (NUM_HEADS, HIDDEN), jnp.float32),
        bn_beta=0.05 * jax.random.normal(keys[NUM_HOPS + 4],
                                         (NUM_HEADS, HIDDEN), jnp.float32),
        bn_rm=jnp.zeros((NUM_HEADS, HIDDEN), jnp.float32),
        bn_rv=jnp.ones((NUM_HEADS, HIDDEN), jnp.float32),
    )


# ---------------- parameter packing (one-time, host side) ---------------------------
def pack_params(params):
    H, C, K, IN, OUT = NUM_HEADS, HIDDEN, NUM_HOPS, IN_FEATS, OUT_FEATS

    def bn_fold(p):          # eval-mode BN -> per-channel (scale, shift)
        s = np.asarray(p["bn_gamma"], np.float32) / np.sqrt(
            np.asarray(p["bn_rv"], np.float32) + BN_EPS)
        t = np.asarray(p["bn_beta"], np.float32) - np.asarray(p["bn_rm"], np.float32) * s
        return s, t

    # SAGN-level MultiHeadBatchNorm fold (scale into enc layer-1 / res_fc columns)
    bs, bt = bn_fold(params)                                     # (H, C)
    assert np.all(np.abs(bs) > 1e-6), "BN scale ~0: cannot compensate attention rows"
    bs_flat = bs.reshape(-1)                                     # lane order h*C + c

    w48  = np.zeros((2, KIN, KHC), np.float32)
    w192 = np.zeros((5, KHC, KHC), np.float32)
    w6   = np.zeros((3, 8, KHC), np.float32)
    bias = np.zeros((8, KHC), np.float32)

    # --- hop encoders (hops+heads packed along lanes; internal BN folded into layer 0) ---
    for k in range(K):
        ep = params["enc"][k]
        s0, t0 = bn_fold(ep)
        W0 = np.asarray(ep["W0"], np.float32); b0 = np.asarray(ep["b0"], np.float32)
        W1 = np.asarray(ep["W1"], np.float32); b1 = np.asarray(ep["b1"], np.float32)
        for h in range(H):
            rows = slice(k * IN, (k + 1) * IN)
            cols = slice(k * HC + h * C, k * HC + (h + 1) * C)
            w48[0, rows, cols] = W0[h] * s0[h][None, :]
            bias[0, cols] = b0[h] * s0[h] + t0[h]
            w192[0, cols, cols] = W1[h] * bs[h][None, :]          # SAGN-BN scale folded
            bias[1, cols] = b1[h] * bs[h]

    # --- res_fc on hop-0 features (SAGN-BN scale folded), in the hop-0 lane block ---
    w48[1, 0:IN, 0:HC] = np.asarray(params["res_W"], np.float32) * bs_flat[None, :]

    # --- packed hop attention A_l + A_r (focal='first'), 1/scale compensation ---
    al = np.asarray(params["attn_l"], np.float32)                 # (H, C)
    ar = np.asarray(params["attn_r"], np.float32)
    for h in range(H):
        for k in range(K):
            col = h * K + k
            w192[1, k * HC + h * C:k * HC + (h + 1) * C, col] += al[h] / bs[h]
            w192[1, 0 * HC + h * C:0 * HC + (h + 1) * C, col] += ar[h] / bs[h]

    # --- S: sum the K hop blocks into the (H*C)-wide output ---
    for k in range(K):
        w192[2, k * HC:(k + 1) * HC, 0:HC] = np.eye(HC, dtype=np.float32)

    # --- post encoder (per-head block-diag; internal BN + head-mean folded) ---
    pe = params["post"]
    ps0, pt0 = bn_fold(pe)
    pW0 = np.asarray(pe["W0"], np.float32); pb0 = np.asarray(pe["b0"], np.float32)
    pW1 = np.asarray(pe["W1"], np.float32); pb1 = np.asarray(pe["b1"], np.float32)
    for h in range(H):
        cols = slice(h * C, (h + 1) * C)
        w192[3, cols, cols] = pW0[h] * ps0[h][None, :]
        bias[3, cols] = pb0[h] * ps0[h] + pt0[h]
        w192[4, cols, 0:OUT] = pW1[h] / H                          # head-mean folded
    bias[4, 0:OUT] = np.mean(pb1, axis=0)

    # --- SAGN BN shift (scale already folded upstream) ---
    bias[2, 0:HC] = bt.reshape(-1)

    # --- tiny structural matrices: softmax group-sum, a->lane broadcast, a head-mean ---
    for h in range(H):
        w6[0, h * K:(h + 1) * K, h * K:(h + 1) * K] = 1.0
        for k in range(K):
            w6[1, h * K + k, k * HC + h * C:k * HC + (h + 1) * C] = 1.0
            w6[2, h * K + k, OUT + k] = 1.0 / H

    return dict(
        w48=jnp.asarray(w48, jnp.bfloat16),
        w192=jnp.asarray(w192, jnp.bfloat16),
        w6=jnp.asarray(w6, jnp.bfloat16),
        bias=jnp.asarray(bias, jnp.float32),
    )


if __name__ == "__main__":
    key = jax.random.PRNGKey(0)
    kf, kp = jax.random.split(key)
    feats = jnp.stack([jax.random.normal(jax.random.fold_in(kf, i),
                                         (N_NODES, IN_FEATS), jnp.float32)
                       for i in range(NUM_HOPS)], axis=0)            # (K, N, IN)
    params = init_params(kp)
    packed = pack_params(params)          # one-time packing / BN & head-mean folding

    out, a = jax.jit(sagn_forward)(feats, packed)
    out = jax.block_until_ready(out)
    a = jax.block_until_ready(a)

    assert out.shape == (N_NODES, OUT_FEATS), out.shape
    assert a.shape == (N_NODES, 1, NUM_HOPS), a.shape
    assert jnp.all(jnp.isfinite(out)) and jnp.all(jnp.isfinite(a))
    # attention weights are a softmax over hops -> rows sum to 1 (exact f32 path)
    assert jnp.allclose(jnp.sum(a, axis=-1), 1.0, atol=1e-5)
    print("KERNEL_OK")
</pallas_src>

<mosaic_0001>
module attributes {stable_mosaic.version = 11 : i64} {
  func.func @_sagn_fused_kernel(%arg0: memref<8x48xf32, #tpu.memory_space<vmem>>, %arg1: memref<2x48x192xbf16, #tpu.memory_space<vmem>>, %arg2: memref<5x192x192xbf16, #tpu.memory_space<vmem>>, %arg3: memref<3x8x192xbf16, #tpu.memory_space<vmem>>, %arg4: memref<8x192xf32, #tpu.memory_space<vmem>>, %arg5: memref<8x192xf32, #tpu.memory_space<vmem>>) attributes {dimension_semantics = [], scalar_prefetch = 0 : i64, scratch_operands = 0 : i64, tpu.core_type = #tpu.core_type<tc>} {
    %c0 = arith.constant 0 : index
    %c0_0 = arith.constant 0 : index
    %0 = vector.load %arg4[%c0, %c0_0] : memref<8x192xf32, #tpu.memory_space<vmem>>, vector<8x192xf32>
    %c0_1 = arith.constant 0 : index
    %c0_2 = arith.constant 0 : index
    %1 = vector.load %arg0[%c0_1, %c0_2] : memref<8x48xf32, #tpu.memory_space<vmem>>, vector<8x48xf32>
    %2 = arith.truncf %1 : vector<8x48xf32> to vector<8x48xbf16>
    %c0_3 = arith.constant 0 : index
    %c0_4 = arith.constant 0 : index
    %c0_5 = arith.constant 0 : index
    %3 = vector.load %arg1[%c0_3, %c0_4, %c0_5] : memref<2x48x192xbf16, #tpu.memory_space<vmem>>, vector<1x48x192xbf16>
    %4 = vector.shape_cast %3 : vector<1x48x192xbf16> to vector<48x192xbf16>
    %cst = arith.constant dense<0.000000e+00> : vector<8x192xf32>
    %5 = tpu.matmul %2, %4, %cst {dimension_numbers = #tpu.dot_dimension_numbers<[1], [0], [0], [1], [0, 0, 1, 1], [], []>} : vector<8x48xbf16>, vector<48x192xbf16>, vector<8x192xf32> -> vector<8x192xf32>
    %6 = vector.extract_strided_slice %0 {offsets = [0, 0], sizes = [1, 192], strides = [1, 1]} : vector<8x192xf32> to vector<1x192xf32>
    %7 = vector.broadcast %6 : vector<1x192xf32> to vector<8x192xf32>
    %8 = arith.addf %5, %7 : vector<8x192xf32>
    %cst_6 = arith.constant 0.000000e+00 : f32
    %9 = vector.broadcast %cst_6 : f32 to vector<8x192xf32>
    %10 = arith.maximumf %8, %9 : vector<8x192xf32>
    %c1 = arith.constant 1 : index
    %c0_7 = arith.constant 0 : index
    %c0_8 = arith.constant 0 : index
    %11 = vector.load %arg1[%c1, %c0_7, %c0_8] : memref<2x48x192xbf16, #tpu.memory_space<vmem>>, vector<1x48x192xbf16>
    %12 = vector.shape_cast %11 : vector<1x48x192xbf16> to vector<48x192xbf16>
    %cst_9 = arith.constant dense<0.000000e+00> : vector<8x192xf32>
    %13 = tpu.matmul %2, %12, %cst_9 {dimension_numbers = #tpu.dot_dimension_numbers<[1], [0], [0], [1], [0, 0, 1, 1], [], []>} : vector<8x48xbf16>, vector<48x192xbf16>, vector<8x192xf32> -> vector<8x192xf32>
    %c0_10 = arith.constant 0 : index
    %c0_11 = arith.constant 0 : index
    %c0_12 = arith.constant 0 : index
    %14 = vector.load %arg2[%c0_10, %c0_11, %c0_12] : memref<5x192x192xbf16, #tpu.memory_space<vmem>>, vector<1x192x192xbf16>
    %15 = vector.shape_cast %14 : vector<1x192x192xbf16> to vector<192x192xbf16>
    %16 = arith.truncf %10 : vector<8x192xf32> to vector<8x192xbf16>
    %cst_13 = arith.constant dense<0.000000e+00> : vector<8x192xf32>
    %17 = tpu.matmul %16, %15, %cst_13 {dimension_numbers = #tpu.dot_dimension_numbers<[1], [0], [0], [1], [0, 0, 1, 1], [], []>} : vector<8x192xbf16>, vector<192x192xbf16>, vector<8x192xf32> -> vector<8x192xf32>
    %18 = vector.extract_strided_slice %0 {offsets = [1, 0], sizes = [1, 192], strides = [1, 1]} : vector<8x192xf32> to vector<1x192xf32>
    %19 = vector.broadcast %18 : vector<1x192xf32> to vector<8x192xf32>
    %20 = arith.addf %17, %19 : vector<8x192xf32>
    %c1_14 = arith.constant 1 : index
    %c0_15 = arith.constant 0 : index
    %c0_16 = arith.constant 0 : index
    %21 = vector.load %arg2[%c1_14, %c0_15, %c0_16] : memref<5x192x192xbf16, #tpu.memory_space<vmem>>, vector<1x192x192xbf16>
    %22 = vector.shape_cast %21 : vector<1x192x192xbf16> to vector<192x192xbf16>
    %23 = arith.truncf %20 : vector<8x192xf32> to vector<8x192xbf16>
    %cst_17 = arith.constant dense<0.000000e+00> : vector<8x192xf32>
    %24 = tpu.matmul %23, %22, %cst_17 {dimension_numbers = #tpu.dot_dimension_numbers<[1], [0], [0], [1], [0, 0, 1, 1], [], []>} : vector<8x192xbf16>, vector<192x192xbf16>, vector<8x192xf32> -> vector<8x192xf32>
    %25 = vector.extract_strided_slice %24 {offsets = [0, 0], sizes = [8, 6], strides = [1, 1]} : vector<8x192xf32> to vector<8x6xf32>
    %cst_18 = arith.constant 0.000000e+00 : f32
    %26 = vector.broadcast %cst_18 : f32 to vector<8x6xf32>
    %27 = arith.cmpf oge, %25, %26 : vector<8x6xf32>
    %cst_19 = arith.constant 2.000000e-01 : f32
    %28 = vector.broadcast %cst_19 : f32 to vector<8x6xf32>
    %29 = arith.mulf %28, %25 : vector<8x6xf32>
    %30 = arith.select %27, %25, %29 : vector<8x6xi1>, vector<8x6xf32>
    %cst_20 = arith.constant dense<0xFF800000> : vector<8xf32>
    %31 = vector.multi_reduction <maximumf>, %30, %cst_20 [1] : vector<8x6xf32> to vector<8xf32>
    %32 = vector.shape_cast %31 : vector<8xf32> to vector<8x1xf32>
    %33 = vector.broadcast %32 : vector<8x1xf32> to vector<8x6xf32>
    %34 = arith.subf %30, %33 : vector<8x6xf32>
    %35 = math.exp %34 : vector<8x6xf32>
    %c0_21 = arith.constant 0 : index
    %c0_22 = arith.constant 0 : index
    %c0_23 = arith.constant 0 : index
    %36 = vector.load %arg3[%c0_21, %c0_22, %c0_23] : memref<3x8x192xbf16, #tpu.memory_space<vmem>>, vector<1x8x192xbf16>
    %37 = vector.shape_cast %36 : vector<1x8x192xbf16> to vector<8x192xbf16>
    %38 = vector.extract_strided_slice %37 {offsets = [0, 0], sizes = [6, 6], strides = [1, 1]} : vector<8x192xbf16> to vector<6x6xbf16>
    %39 = arith.extf %38 : vector<6x6xbf16> to vector<6x6xf32>
    %cst_24 = arith.constant dense<0.000000e+00> : vector<8x6xf32>
    %40 = tpu.matmul %35, %39, %cst_24 {dimension_numbers = #tpu.dot_dimension_numbers<[1], [0], [0], [1], [0, 0, 1, 1], [], []>} : vector<8x6xf32>, vector<6x6xf32>, vector<8x6xf32> -> vector<8x6xf32>
    %cst_25 = arith.constant 1.000000e+00 : f32
    %41 = vector.broadcast %cst_25 : f32 to vector<8x6xf32>
    %42 = arith.divf %41, %40 : vector<8x6xf32>
    %43 = arith.mulf %35, %42 : vector<8x6xf32>
    %c1_26 = arith.constant 1 : index
    %c0_27 = arith.constant 0 : index
    %c0_28 = arith.constant 0 : index
    %44 = vector.load %arg3[%c1_26, %c0_27, %c0_28] : memref<3x8x192xbf16, #tpu.memory_space<vmem>>, vector<1x8x192xbf16>
    %45 = vector.shape_cast %44 : vector<1x8x192xbf16> to vector<8x192xbf16>
    %46 = vector.extract_strided_slice %45 {offsets = [0, 0], sizes = [6, 192], strides = [1, 1]} : vector<8x192xbf16> to vector<6x192xbf16>
    %47 = arith.extf %46 : vector<6x192xbf16> to vector<6x192xf32>
    %cst_29 = arith.constant dense<0.000000e+00> : vector<8x192xf32>
    %48 = tpu.matmul %43, %47, %cst_29 {dimension_numbers = #tpu.dot_dimension_numbers<[1], [0], [0], [1], [0, 0, 1, 1], [], []>} : vector<8x6xf32>, vector<6x192xf32>, vector<8x192xf32> -> vector<8x192xf32>
    %49 = arith.mulf %20, %48 : vector<8x192xf32>
    %50 = arith.addf %49, %13 : vector<8x192xf32>
    %c2 = arith.constant 2 : index
    %c0_30 = arith.constant 0 : index
    %c0_31 = arith.constant 0 : index
    %51 = vector.load %arg2[%c2, %c0_30, %c0_31] : memref<5x192x192xbf16, #tpu.memory_space<vmem>>, vector<1x192x192xbf16>
    %52 = vector.shape_cast %51 : vector<1x192x192xbf16> to vector<192x192xbf16>
    %53 = arith.truncf %50 : vector<8x192xf32> to vector<8x192xbf16>
    %cst_32 = arith.constant dense<0.000000e+00> : vector<8x192xf32>
    %54 = tpu.matmul %53, %52, %cst_32 {dimension_numbers = #tpu.dot_dimension_numbers<[1], [0], [0], [1], [0, 0, 1, 1], [], []>} : vector<8x192xbf16>, vector<192x192xbf16>, vector<8x192xf32> -> vector<8x192xf32>
    %55 = vector.extract_strided_slice %0 {offsets = [2, 0], sizes = [1, 192], strides = [1, 1]} : vector<8x192xf32> to vector<1x192xf32>
    %56 = vector.broadcast %55 : vector<1x192xf32> to vector<8x192xf32>
    %57 = arith.addf %54, %56 : vector<8x192xf32>
    %cst_33 = arith.constant 0.000000e+00 : f32
    %58 = vector.broadcast %cst_33 : f32 to vector<8x192xf32>
    %59 = arith.maximumf %57, %58 : vector<8x192xf32>
    %c3 = arith.constant 3 : index
    %c0_34 = arith.constant 0 : index
    %c0_35 = arith.constant 0 : index
    %60 = vector.load %arg2[%c3, %c0_34, %c0_35] : memref<5x192x192xbf16, #tpu.memory_space<vmem>>, vector<1x192x192xbf16>
    %61 = vector.shape_cast %60 : vector<1x192x192xbf16> to vector<192x192xbf16>
    %62 = arith.truncf %59 : vector<8x192xf32> to vector<8x192xbf16>
    %cst_36 = arith.constant dense<0.000000e+00> : vector<8x192xf32>
    %63 = tpu.matmul %62, %61, %cst_36 {dimension_numbers = #tpu.dot_dimension_numbers<[1], [0], [0], [1], [0, 0, 1, 1], [], []>} : vector<8x192xbf16>, vector<192x192xbf16>, vector<8x192xf32> -> vector<8x192xf32>
    %64 = vector.extract_strided_slice %0 {offsets = [3, 0], sizes = [1, 192], strides = [1, 1]} : vector<8x192xf32> to vector<1x192xf32>
    %65 = vector.broadcast %64 : vector<1x192xf32> to vector<8x192xf32>
    %66 = arith.addf %63, %65 : vector<8x192xf32>
    %cst_37 = arith.constant 0.000000e+00 : f32
    %67 = vector.broadcast %cst_37 : f32 to vector<8x192xf32>
    %68 = arith.maximumf %66, %67 : vector<8x192xf32>
    %c4 = arith.constant 4 : index
    %c0_38 = arith.constant 0 : index
    %c0_39 = arith.constant 0 : index
    %69 = vector.load %arg2[%c4, %c0_38, %c0_39] : memref<5x192x192xbf16, #tpu.memory_space<vmem>>, vector<1x192x192xbf16>
    %70 = vector.shape_cast %69 : vector<1x192x192xbf16> to vector<192x192xbf16>
    %71 = arith.truncf %68 : vector<8x192xf32> to vector<8x192xbf16>
    %cst_40 = arith.constant dense<0.000000e+00> : vector<8x192xf32>
    %72 = tpu.matmul %71, %70, %cst_40 {dimension_numbers = #tpu.dot_dimension_numbers<[1], [0], [0], [1], [0, 0, 1, 1], [], []>} : vector<8x192xbf16>, vector<192x192xbf16>, vector<8x192xf32> -> vector<8x192xf32>
    %c2_41 = arith.constant 2 : index
    %c0_42 = arith.constant 0 : index
    %c0_43 = arith.constant 0 : index
    %73 = vector.load %arg3[%c2_41, %c0_42, %c0_43] : memref<3x8x192xbf16, #tpu.memory_space<vmem>>, vector<1x8x192xbf16>
    %74 = vector.shape_cast %73 : vector<1x8x192xbf16> to vector<8x192xbf16>
    %75 = vector.extract_strided_slice %74 {offsets = [0, 0], sizes = [6, 192], strides = [1, 1]} : vector<8x192xbf16> to vector<6x192xbf16>
    %76 = arith.extf %75 : vector<6x192xbf16> to vector<6x192xf32>
    %cst_44 = arith.constant dense<0.000000e+00> : vector<8x192xf32>
    %77 = tpu.matmul %43, %76, %cst_44 {dimension_numbers = #tpu.dot_dimension_numbers<[1], [0], [0], [1], [0, 0, 1, 1], [], []>} : vector<8x6xf32>, vector<6x192xf32>, vector<8x192xf32> -> vector<8x192xf32>
    %78 = arith.addf %72, %77 : vector<8x192xf32>
    %79 = vector.extract_strided_slice %0 {offsets = [4, 0], sizes = [1, 192], strides = [1, 1]} : vector<8x192xf32> to vector<1x192xf32>
    %80 = vector.broadcast %79 : vector<1x192xf32> to vector<8x192xf32>
    %81 = arith.addf %78, %80 : vector<8x192xf32>
    %c0_45 = arith.constant 0 : index
    %c0_46 = arith.constant 0 : index
    %82 = vector.load %arg5[%c0_45, %c0_46] : memref<8x192xf32, #tpu.memory_space<vmem>>, vector<8x192xf32>
    tpu.vector_store %arg5[%c0_45, %c0_46], %81 {strides = array<i32>} : memref<8x192xf32, #tpu.memory_space<vmem>>, vector<8x192xf32>,
    return
  }
}

</mosaic_0001>

<bundles_post_ra>
// kernel: sagn_forward.1
= control target key start
LH: loop header
LB: loop body
LE: loop exit
PB: predicated region body
PF: predicated region fallthrough
CT: control target
= control target key end

     0   :  { %10 = vsyncpa [#allocation3], 0  ;;  %s2128_s0 = inlined_call_operand.vmem [shape: f32[8,48], index: 0, kind: input, shape index: {}]   ;;  %s2129_s1 = inlined_call_operand.vmem [shape: bf16[2,48,192], index: 1, kind: input, shape index: {}]   ;;  %s2130_s2 = inlined_call_operand.hbm [shape: bf16[5,192,192], index: 2, kind: input, shape index: {}]   ;;  %s2131_s3 = inlined_call_operand.hbm [shape: bf16[3,8,192], index: 3, kind: input, shape index: {}]   ;;  %s2132_s4 = inlined_call_operand.hbm [shape: f32[8,192], index: 4, kind: input, shape index: {}]   ;;  %s2133_s5 = inlined_call_operand.vmem [shape: f32[8,192], index: 5, kind: output, shape index: {}]  }
   0x1   :  { %11 = vsyncpa [#allocation5], 0  ;;  %s1934_s18 = smov [#allocation4]   ;;  %s1935_s20 = smov [#allocation2]  }
   0x2   :  { %s33_s19 = sshll.u32 %s1934_s18, 4  ;;  %s21_s21 = sshll.u32 %s1935_s20, 4  ;;  %s34_s19 = int_to_ptr.vmem [resolvable:$true] %s33_s19  ;;  %s1972_s21 = int_to_ptr.vmem [resolvable:$true] %s21_s21 }
   0x3   :  { %s1864_s24 = scalar_lea.hbm %s2131_s3, 384 }
   0x4   :  { %p1865_p0 = scmp.ne.s32.totalorder %s2131_s3, %s1864_s24  ;;  %p1868_p1 = scmp.lt.u32.totalorder %s1864_s24, %s2131_s3 }
   0x6   :  { %p1870_p2 = pnand %p1868_p1, %p1865_p0 }
   0x8   :  { %1873 = shalt.err (!%p1870_p2)
}
   0x9   :  { %s1874_s29 = scalar_lea.vmem %s34_s19, 384  ;;  %p1879_p4 = scmp.lt.s32.totalorder %s34_s19, %s34_s19 }
   0xa   :  { %p1875_p3 = scmp.ne.s32.totalorder %s34_s19, %s1874_s29  ;;  %p1880_p5 = scmp.lt.s32.totalorder %s1874_s29, %s1874_s29 }
   0xc   :  { %p1881_p6 = por %p1880_p5, %p1879_p4 }
   0xe   :  { %p1882_p7 = pnand %p1881_p6, %p1875_p3 }
  0x10   :  { %1885 = shalt.err (!%p1882_p7)
}
  0x11   :  { %s1936_s30 = smov 128   ;;  %s1937_s6 = smov 8  }
  0x12   :  { %39 = dma.hbm_to_vmem [thread:$0]  %s2131_s3, 384, %s34_s19, [#allocation5], %s1936_s30, %s1936_s30, %s1937_s6  }
  0x13   :  { %s1886_s11 = scalar_lea.hbm %s2130_s2, 15360 }
  0x14   :  { %p1887_p8 = scmp.ne.s32.totalorder %s2130_s2, %s1886_s11  ;;  %p1890_p9 = scmp.lt.u32.totalorder %s1886_s11, %s2130_s2 }
  0x16   :  { %p1892_p10 = pnand %p1890_p9, %p1887_p8 }
  0x18   :  { %1895 = shalt.err (!%p1892_p10)
}
  0x19   :  { %s1896_s16 = scalar_lea.vmem %s1972_s21, 15360  ;;  %p1901_p12 = scmp.lt.s32.totalorder %s1972_s21, %s1972_s21 }
  0x1a   :  { %p1897_p11 = scmp.ne.s32.totalorder %s1972_s21, %s1896_s16  ;;  %p1902_p13 = scmp.lt.s32.totalorder %s1896_s16, %s1896_s16 }
  0x1c   :  { %p1903_p0 = por %p1902_p13, %p1901_p12 }
  0x1e   :  { %p1904_p1 = pnand %p1903_p0, %p1897_p11 }
  0x20   :  { %1907 = shalt.err (!%p1904_p1)
}
  0x21   :  { %27 = dma.hbm_to_vmem [thread:$0]  %s2130_s2, 15360, %s1972_s21, [#allocation3], %s1936_s30, %s1936_s30, %s1937_s6  }
  0x22   :  { %s1938_s18 = smov [#allocation6]   ;;  %s1908_s23 = scalar_lea.hbm %s2132_s4, 256 }
  0x23   :  { %s46_s19 = sshll.u32 %s1938_s18, 4  ;;  %p1909_p2 = scmp.ne.s32.totalorder %s2132_s4, %s1908_s23  ;;  %s47_s19 = int_to_ptr.vmem [resolvable:$true] %s46_s19 }
  0x24   :  { %p1912_p3 = scmp.lt.u32.totalorder %s1908_s23, %s2132_s4 }
  0x26   :  { %p1914_p4 = pnand %p1912_p3, %p1909_p2 }
  0x28   :  { %1917 = shalt.err (!%p1914_p4)
}
  0x29   :  { %s1918_s28 = scalar_lea.vmem %s47_s19, 256  ;;  %p1923_p6 = scmp.lt.s32.totalorder %s47_s19, %s47_s19 }
  0x2a   :  { %p1919_p5 = scmp.ne.s32.totalorder %s47_s19, %s1918_s28  ;;  %p1924_p7 = scmp.lt.s32.totalorder %s1918_s28, %s1918_s28 }
  0x2c   :  { %p1925_p8 = por %p1924_p7, %p1923_p6 }
  0x2e   :  { %p1926_p9 = pnand %p1925_p8, %p1919_p5 }
  0x30   :  { %1929 = shalt.err (!%p1926_p9)
}
  0x31   :  { %49 = dma.hbm_to_vmem [thread:$0]  %s2132_s4, 256, %s47_s19, [#allocation5]  }
  0x32   :  { %1930 = dma.done.wait [#allocation3], 15360  }
  0x33   :  { %1931 = vsyncadd [#allocation3], 4294951936 }
  0x34   :  { %1932 = dma.done.wait [#allocation5], 640  }
  0x35   :  { %1933 = vsyncadd [#allocation5], 4294966656  ;;  %v1939_v0 = vmov 0   ;;  %v1662_v1 = vld [vmem:[%s2129_s1 + $0x4] ss:$8 sps:$4 sm:$0xff]   ;;  %vm108_vm0 = vcmask 392192   ;;  %v70_v60 = vlaneseq }
  0x36   :  { %144 = vmatprep.mubr.bf16.mxu0 %v1939_v0  ;;  %v1664_v2 = vld [vmem:[%s2129_s1] ss:$8 sps:$4 sm:$0xff]   ;;  %112 = vmatprep.subr.bf16.mxu0 %v1662_v1  ;;  %v1665_v3 = vld [vmem:[%s2129_s1 + $0x14] ss:$8 sps:$4 sm:$0xff]   ;;  %v1667_v4 = vld [vmem:[%s2129_s1 + $0x10] ss:$8 sps:$4 sm:$0xff]  }
  0x37   :  { %113 = vmatpush1.bf16.msra.mxu0 %v1664_v2  ;;  %v1668_v5 = vld [vmem:[%s2129_s1 + $0x24] ss:$8 sps:$4 sm:$0xff]   ;;  %v1670_v6 = vld [vmem:[%s2129_s1 + $0x20] ss:$8 sps:$4 sm:$0xff]   ;;  %v1673_v8 = vld [vmem:[%s2129_s1 + $0x34] ss:$8 sps:$4 sm:$0xff]  }
  0x38   :  { %114 = vmatprep.subr.bf16.mxu0 %v1665_v3  ;;  %v62_v7 = vld [vmem:[%s2128_s0] sm:$0xff]  ;;  %v1671_v10 = vld [vmem:[%s2129_s1 + $0x30] ss:$8 sps:$4 sm:$0xff]   ;;  %v1679_v13 = vld [vmem:[%s2129_s1 + $0x54] ss:$8 sps:$4 sm:$0xff]   ;;  %v2056_v61 = vshrl.u32 %v70_v60, 7 }
  0x39   :  { %v63_v9 = vpack.c.bf16 %v62_v7, %v62_v7  ;;  %v1676_v11 = vld [vmem:[%s2129_s1 + $0x44] ss:$8 sps:$4 sm:$0xff]   ;;  %v1674_v12 = vld [vmem:[%s2129_s1 + $0x40] ss:$8 sps:$4 sm:$0xff]   ;;  %v1677_v14 = vld [vmem:[%s2129_s1 + $0x50] ss:$8 sps:$4 sm:$0xff]  }
  0x3a   :  { %v1682_v15 = vld [vmem:[#allocation2 + $0x4] ss:$8 sps:$4 sm:$0xff]   ;;  %v1680_v16 = vld [vmem:[#allocation2] ss:$8 sps:$4 sm:$0xff]   ;;  %v1685_v17 = vld [vmem:[#allocation2 + $0x14] ss:$8 sps:$4 sm:$0xff]  }
  0x3b   :  { %115 = vmatpush1.bf16.msra.mxu0 %v1667_v4  ;;  %v1683_v18 = vld [vmem:[#allocation2 + $0x10] ss:$8 sps:$4 sm:$0xff]   ;;  %v1688_v19 = vld [vmem:[#allocation2 + $0x24] ss:$8 sps:$4 sm:$0xff]   ;;  %v1686_v20 = vld [vmem:[#allocation2 + $0x20] ss:$8 sps:$4 sm:$0xff]  }
  0x3c   :  { %116 = vmatprep.subr.bf16.mxu0 %v1668_v5  ;;  %v1691_v21 = vld [vmem:[#allocation2 + $0x34] ss:$8 sps:$4 sm:$0xff]   ;;  %v1689_v22 = vld [vmem:[#allocation2 + $0x30] ss:$8 sps:$4 sm:$0xff]   ;;  %v1694_v23 = vld [vmem:[#allocation2 + $0x44] ss:$8 sps:$4 sm:$0xff]  }
  0x3d   :  { %v1692_v24 = vld [vmem:[#allocation2 + $0x40] ss:$8 sps:$4 sm:$0xff]   ;;  %v1697_v25 = vld [vmem:[#allocation2 + $0x54] ss:$8 sps:$4 sm:$0xff]   ;;  %v1695_v26 = vld [vmem:[#allocation2 + $0x50] ss:$8 sps:$4 sm:$0xff]  }
  0x3e   :  { %v1700_v27 = vld [vmem:[#allocation2 + $0x64] ss:$8 sps:$4 sm:$0xff]   ;;  %v1698_v28 = vld [vmem:[#allocation2 + $0x60] ss:$8 sps:$4 sm:$0xff]   ;;  %v1703_v29 = vld [vmem:[#allocation2 + $0x74] ss:$8 sps:$4 sm:$0xff]  }
  0x3f   :  { %117 = vmatpush1.bf16.msra.mxu0 %v1670_v6  ;;  %v1701_v30 = vld [vmem:[#allocation2 + $0x70] ss:$8 sps:$4 sm:$0xff]   ;;  %v1706_v31 = vld [vmem:[#allocation2 + $0x84] ss:$8 sps:$4 sm:$0xff]   ;;  %v1704_v32 = vld [vmem:[#allocation2 + $0x80] ss:$8 sps:$4 sm:$0xff]  }
  0x40   :  { %192 = vmatprep.subr.bf16.mxu0 %v1673_v8  ;;  %v1709_v33 = vld [vmem:[#allocation2 + $0x94] ss:$8 sps:$4 sm:$0xff]   ;;  %v1707_v34 = vld [vmem:[#allocation2 + $0x90] ss:$8 sps:$4 sm:$0xff]   ;;  %v1712_v35 = vld [vmem:[#allocation2 + $0xa4] ss:$8 sps:$4 sm:$0xff]  }
  0x41   :  { %v1710_v36 = vld [vmem:[#allocation2 + $0xa0] ss:$8 sps:$4 sm:$0xff]   ;;  %v1715_v37 = vld [vmem:[#allocation2 + $0xb4] ss:$8 sps:$4 sm:$0xff]   ;;  %v1713_v38 = vld [vmem:[#allocation2 + $0xb0] ss:$8 sps:$4 sm:$0xff]  }
  0x42   :  { %1500 = vmatmul.mubr.msk.bf16.vlgmr.msra.gmra.mrb[0].mxu0 %vm108_vm0, %v63_v9  ;;  %v1716_v39 = vld [vmem:[#allocation2 + $0xc4] ss:$8 sps:$4 sm:$0xff]   ;;  %v1718_v40 = vld [vmem:[#allocation2 + $0xc0] ss:$8 sps:$4 sm:$0xff]   ;;  %v1719_v41 = vld [vmem:[#allocation2 + $0xd4] ss:$8 sps:$4 sm:$0xff]  }
  0x43   :  { %193 = vmatpush1.bf16.msra.mxu0 %v1671_v10  ;;  %224 = vmatprep.mubr.bf16.mxu0 %v1939_v0  ;;  %v1721_v42 = vld [vmem:[#allocation2 + $0xd0] ss:$8 sps:$4 sm:$0xff]   ;;  %v1722_v43 = vld [vmem:[#allocation2 + $0xe4] ss:$8 sps:$4 sm:$0xff]   ;;  %v1724_v44 = vld [vmem:[#allocation2 + $0xe0] ss:$8 sps:$4 sm:$0xff]  }
  0x44   :  { %194 = vmatprep.subr.bf16.mxu0 %v1676_v11  ;;  %582 = vmatprep.subr.bf16.mxu1 %v1716_v39  ;;  %v1725_v45 = vld [vmem:[#allocation2 + $0xf4] ss:$8 sps:$4 sm:$0xff]   ;;  %v1727_v46 = vld [vmem:[#allocation2 + $0xf0] ss:$8 sps:$4 sm:$0xff]   ;;  %v1728_v47 = vld [vmem:[#allocation2 + $0x104] ss:$8 sps:$4 sm:$0xff]  }
  0x45   :  { %583 = vmatpush1.bf16.msra.mxu1 %v1718_v40  ;;  %v1730_v48 = vld [vmem:[#allocation2 + $0x100] ss:$8 sps:$4 sm:$0xff]   ;;  %v1731_v49 = vld [vmem:[#allocation2 + $0x114] ss:$8 sps:$4 sm:$0xff]   ;;  %v1733_v50 = vld [vmem:[#allocation2 + $0x110] ss:$8 sps:$4 sm:$0xff]  }
  0x46   :  { %584 = vmatprep.subr.bf16.mxu1 %v1719_v41  ;;  %v1734_v51 = vld [vmem:[#allocation2 + $0x124] ss:$8 sps:$4 sm:$0xff]   ;;  %v1736_v52 = vld [vmem:[#allocation2 + $0x120] ss:$8 sps:$4 sm:$0xff]   ;;  %v1737_v53 = vld [vmem:[#allocation2 + $0x134] ss:$8 sps:$4 sm:$0xff]  }
  0x47   :  { %195 = vmatpush1.bf16.msra.mxu0 %v1674_v12  ;;  %v1739_v54 = vld [vmem:[#allocation2 + $0x130] ss:$8 sps:$4 sm:$0xff]   ;;  %v1740_v55 = vld [vmem:[#allocation2 + $0x144] ss:$8 sps:$4 sm:$0xff]   ;;  %v1742_v56 = vld [vmem:[#allocation2 + $0x140] ss:$8 sps:$4 sm:$0xff]  }
  0x48   :  { %196 = vmatprep.subr.bf16.mxu0 %v1679_v13  ;;  %v1743_v57 = vld [vmem:[#allocation2 + $0x154] ss:$8 sps:$4 sm:$0xff]   ;;  %v1745_v58 = vld [vmem:[#allocation2 + $0x150] ss:$8 sps:$4 sm:$0xff]   ;;  %v1746_v59 = vld [vmem:[#allocation2 + $0x164] ss:$8 sps:$4 sm:$0xff]  }
  0x49   :  { %585 = vmatpush1.bf16.msra.mxu1 %v1721_v42  ;;  %v72_v62 = vsub.s32 0, %v2056_v61  ;;  %v2059_v63 = vld [vmem:[#allocation6] sm:$0xff]  ;;  %v2061_v0 = vld [vmem:[#allocation6 + $0x8] sm:$0xff]  ;;  %vm387_vm1 = vcmask 523264   ;;  %vm625_vm3 = vcmask 48128   ;;  %vm637_vm4 = vcmask 1045504  }
  0x4a   :  { %586 = vmatprep.subr.bf16.mxu1 %v1722_v43  ;;  %v1940_v39 = vmov 0.0   ;;  %vm1941_vm5 = vmmov 0   ;;  %v1766_v60 = vld [vmem:[#allocation2 + $0x1c4] ss:$8 sps:$4 sm:$0xff]  }
  0x4b   :  { %197 = vmatpush1.bf16.msra.mxu0 %v1677_v14  ;;  %v73_v1 = vrot.slane %v2059_v63, %v72_v62  ;;  %v77_v2 = vrot.slane %v2061_v0, %v72_v62  ;;  %v1764_v62 = vld [vmem:[#allocation2 + $0x1c0] ss:$8 sps:$4 sm:$0xff]  }
  0x4c   :  { %391 = vmatprep.subr.bf16.mxu0 %v1682_v15 }
  0x4d   :  { %587 = vmatpush1.bf16.msra.mxu1 %v1724_v44 }
  0x4e   :  { %1513 = vmatmul.mubr.msk.bf16.vlgmr.msra.gmra.mrb[4].mxu0 %vm108_vm0, %v63_v9  ;;  %588 = vmatprep.subr.bf16.mxu1 %v1725_v45  ;;  %v715_v45 = vld [vmem:[#allocation4 + $0x8] sm:$0xff] }
  0x4f   :  { %392 = vmatpush1.bf16.msra.mxu0 %v1680_v16 }
  0x50   :  { %393 = vmatprep.subr.bf16.mxu0 %v1685_v17  ;;  %v1748_v17 = vld [vmem:[#allocation2 + $0x160] ss:$8 sps:$4 sm:$0xff]  }
  0x51   :  { %589 = vmatpush1.bf16.msra.mxu1 %v1727_v46  ;;  %v717_v46 = vunpack.c.h.bf16 %v715_v45 }
  0x52   :  { %590 = vmatprep.subr.bf16.mxu1 %v1728_v47  ;;  %v716_v47 = vunpack.c.l.bf16 %v715_v45 }
  0x53   :  { %394 = vmatpush1.bf16.msra.mxu0 %v1683_v18  ;;  %v1749_v18 = vld [vmem:[#allocation2 + $0x174] ss:$8 sps:$4 sm:$0xff]  }
  0x54   :  { %395 = vmatprep.subr.bf16.mxu0 %v1688_v19  ;;  %v1751_v19 = vld [vmem:[#allocation2 + $0x170] ss:$8 sps:$4 sm:$0xff]  }
  0x55   :  { %591 = vmatpush1.bf16.msra.mxu1 %v1730_v48  ;;  %v1754_v48 = vld [vmem:[#allocation2 + $0x184] ss:$8 sps:$4 sm:$0xff]  }
  0x56   :  { %592 = vmatprep.subr.bf16.mxu1 %v1731_v49 }
  0x57   :  { %396 = vmatpush1.bf16.msra.mxu0 %v1686_v20  ;;  %v261_v20 = vsub.s32 1, %v2056_v61 }
  0x58   :  { %397 = vmatprep.subr.bf16.mxu0 %v1691_v21 }
  0x59   :  { %593 = vmatpush1.bf16.msra.mxu1 %v1733_v50  ;;  %v262_v21 = vrot.slane %v2059_v63, %v261_v20 }
  0x5a   :  { %594 = vmatprep.subr.bf16.mxu1 %v1734_v51 }
  0x5b   :  { %398 = vmatpush1.bf16.msra.mxu0 %v1689_v22  ;;  %v266_v22 = vrot.slane %v2061_v0, %v261_v20  ;;  %v1790_v20 = vld [vmem:[#allocation2 + $0x244] ss:$8 sps:$4 sm:$0xff]  }
  0x5c   :  { %399 = vmatprep.subr.bf16.mxu0 %v1694_v23 }
  0x5d   :  { %595 = vmatpush1.bf16.msra.mxu1 %v1736_v52  ;;  %v1752_v52 = vld [vmem:[#allocation2 + $0x180] ss:$8 sps:$4 sm:$0xff]  }
  0x5e   :  { %596 = vmatprep.subr.bf16.mxu1 %v1737_v53 }
  0x5f   :  { %400 = vmatpush1.bf16.msra.mxu0 %v1692_v24 }
  0x60   :  { %401 = vmatprep.subr.bf16.mxu0 %v1697_v25 }
  0x61   :  { %597 = vmatpush1.bf16.msra.mxu1 %v1739_v54  ;;  %v1757_v54 = vld [vmem:[#allocation2 + $0x194] ss:$8 sps:$4 sm:$0xff]  }
  0x62   :  { %598 = vmatprep.subr.bf16.mxu1 %v1740_v55  ;;  %v1755_v55 = vld [vmem:[#allocation2 + $0x190] ss:$8 sps:$4 sm:$0xff]  }
  0x63   :  { %402 = vmatpush1.bf16.msra.mxu0 %v1695_v26 }
  0x64   :  { %403 = vmatprep.subr.bf16.mxu0 %v1700_v27 }
  0x65   :  { %599 = vmatpush1.bf16.msra.mxu1 %v1742_v56  ;;  %v1760_v56 = vld [vmem:[#allocation2 + $0x1a4] ss:$8 sps:$4 sm:$0xff]  }
  0x66   :  { %600 = vmatprep.subr.bf16.mxu1 %v1743_v57  ;;  %v1758_v57 = vld [vmem:[#allocation2 + $0x1a0] ss:$8 sps:$4 sm:$0xff]  }
  0x67   :  { %404 = vmatpush1.bf16.msra.mxu0 %v1698_v28 }
  0x68   :  { %405 = vmatprep.subr.bf16.mxu0 %v1703_v29 }
  0x69   :  { %601 = vmatpush1.bf16.msra.mxu1 %v1745_v58  ;;  %v1763_v58 = vld [vmem:[#allocation2 + $0x1b4] ss:$8 sps:$4 sm:$0xff]  }
  0x6a   :  { %602 = vmatprep.subr.bf16.mxu1 %v1746_v59  ;;  %v1761_v59 = vld [vmem:[#allocation2 + $0x1b0] ss:$8 sps:$4 sm:$0xff]  }
  0x6b   :  { %406 = vmatpush1.bf16.msra.mxu0 %v1701_v30 }
  0x6c   :  { %407 = vmatprep.subr.bf16.mxu0 %v1706_v31 }
  0x6d   :  { %603 = vmatpush1.bf16.msra.mxu1 %v1748_v17  ;;  %v1232_v17 = vld [vmem:[#allocation4 + $0x10] sm:$0xff] }
  0x6e   :  { %604 = vmatprep.subr.bf16.mxu1 %v1749_v18  ;;  %v1234_v18 = vunpack.c.h.bf16 %v1232_v17 }
  0x6f   :  { %408 = vmatpush1.bf16.msra.mxu0 %v1704_v32 }
  0x70   :  { %409 = vmatprep.subr.bf16.mxu0 %v1709_v33 }
  0x71   :  { %605 = vmatpush1.bf16.msra.mxu1 %v1751_v19  ;;  %v1788_v19 = vld [vmem:[#allocation2 + $0x240] ss:$8 sps:$4 sm:$0xff]  }
  0x72   :  { %1161 = vmatprep.subr.bf16.mxu1 %v1790_v20  ;;  %v1847_v20 = vld [vmem:[#allocation2 + $0x374] ss:$8 sps:$4 sm:$0xff]  }
  0x73   :  { %410 = vmatpush1.bf16.msra.mxu0 %v1707_v34 }
  0x74   :  { %411 = vmatprep.subr.bf16.mxu0 %v1712_v35 }
  0x77   :  { %412 = vmatpush1.bf16.msra.mxu0 %v1710_v36 }
  0x78   :  { %413 = vmatprep.subr.bf16.mxu0 %v1715_v37 }
  0x7b   :  { %414 = vmatpush1.bf16.msra.mxu0 %v1713_v38  ;;  %v632_v38 = vld [vmem:[#allocation4] sm:$0xf] }
  0x7c   :  { %1649 = vmatprep.subr.mxu0 %v1940_v39  ;;  %v633_v40 = vunpack.c.l.bf16 %v632_v38  ;;  %v1812_v38 = vld [vmem:[#allocation2 + $0x2c0] ss:$8 sps:$4 sm:$0xff]  }
 0x115   :  { %v146_v3 = vpop.f32.mrb[0].mxu0 }
 0x116   :  { %v147_v4 = vadd.f32 %v146_v3, %v73_v1  ;;  %v148_v5 = vpop.f32.mrb[1].mxu0  ;;  %v1769_v1 = vld [vmem:[#allocation2 + $0x1d4] ss:$8 sps:$4 sm:$0xff]   ;;  %v1772_v3 = vld [vmem:[#allocation2 + $0x1e4] ss:$8 sps:$4 sm:$0xff]  }
 0x117   :  { %v149_v6 = vadd.f32 %v148_v5, %v77_v2  ;;  %v150_v7 = vpop.f32.mrb[2].mxu0  ;;  %v1767_v2 = vld [vmem:[#allocation2 + $0x1d0] ss:$8 sps:$4 sm:$0xff]   ;;  %v1775_v5 = vld [vmem:[#allocation2 + $0x1f4] ss:$8 sps:$4 sm:$0xff]  }
 0x118   :  { %v153_v8 = vmax.f32 %v147_v4, 0.0  ;;  %v151_v9 = vpop.f32.mrb[3].mxu0  ;;  %v1770_v4 = vld [vmem:[#allocation2 + $0x1e0] ss:$8 sps:$4 sm:$0xff]   ;;  %v1778_v7 = vld [vmem:[#allocation2 + $0x204] ss:$8 sps:$4 sm:$0xff]  }
 0x119   :  { %v154_v10 = vmax.f32 %v149_v6, 0.0  ;;  %v1773_v6 = vld [vmem:[#allocation2 + $0x1f0] ss:$8 sps:$4 sm:$0xff]   ;;  %v1781_v9 = vld [vmem:[#allocation2 + $0x214] ss:$8 sps:$4 sm:$0xff]  }
 0x11a   :  { %v257_v12 = vpack.c.bf16 %v153_v8, %v153_v8  ;;  %v1776_v8 = vld [vmem:[#allocation2 + $0x200] ss:$8 sps:$4 sm:$0xff]  }
 0x11b   :  { %v258_v11 = vpack.c.bf16 %v154_v10, %v154_v10  ;;  %v1779_v10 = vld [vmem:[#allocation2 + $0x210] ss:$8 sps:$4 sm:$0xff]  }
 0x11d   :  { %1538 = vmatprep.mubr.msk.bf16.mxu0 %vm387_vm1, %v258_v11  ;;  %v1784_v11 = vld [vmem:[#allocation2 + $0x224] ss:$8 sps:$4 sm:$0xff]  }
 0x11e   :  { %424 = vmatmul.mubr.bf16.vlgmr.msra.gmra.mrb[8].mxu0 %v257_v12  ;;  %v1782_v12 = vld [vmem:[#allocation2 + $0x220] ss:$8 sps:$4 sm:$0xff]  }
 0x11f   :  { %1651 = vmatprep.mubr.msk.f32.mxu0 %vm1941_vm5, %v1940_v39  ;;  %1650 = vmatpush3.msk.msra.mxu0 %vm637_vm4, %v633_v40  ;;  %v1817_v40 = vld [vmem:[#allocation2 + $0x2d4] ss:$8 sps:$4 sm:$0xff]  }
 0x120   :  { %1566 = vmatprep.subr.msk.mxu0 %vm637_vm4, %v717_v46 }
 0x121   :  { %v2066_v13 = vpop.f32.mrb[4].mxu0 }
 0x122   :  { %v2068_v14 = vpop.f32.mrb[5].mxu0 }
 0x123   :  { %v230_v15 = vpop.f32.mrb[6].mxu0 }
 0x124   :  { %v231_v16 = vpop.f32.mrb[7].mxu0  ;;  %v1787_v15 = vld [vmem:[#allocation2 + $0x234] ss:$8 sps:$4 sm:$0xff]  }
 0x125   :  { %v1785_v16 = vld [vmem:[#allocation2 + $0x230] ss:$8 sps:$4 sm:$0xff]  }
 0x1f1   :  { %v425_v23 = vpop.f32.mrb[8].mxu0 }
 0x1f2   :  { %v2073_v24 = vadd.f32 %v425_v23, %v262_v21  ;;  %v427_v25 = vpop.f32.mrb[9].mxu0  ;;  %v1793_v21 = vld [vmem:[#allocation2 + $0x254] ss:$8 sps:$4 sm:$0xff]   ;;  %v1796_v23 = vld [vmem:[#allocation2 + $0x264] ss:$8 sps:$4 sm:$0xff]  }
 0x1f3   :  { %v2075_v26 = vadd.f32 %v427_v25, %v266_v22  ;;  %v429_v27 = vpop.f32.mrb[10].mxu0  ;;  %v1791_v22 = vld [vmem:[#allocation2 + $0x250] ss:$8 sps:$4 sm:$0xff]   ;;  %v1794_v25 = vld [vmem:[#allocation2 + $0x260] ss:$8 sps:$4 sm:$0xff]  }
 0x1f4   :  { %v430_v28 = vpop.f32.mrb[11].mxu0  ;;  %v457_v30 = vpack.c.bf16 %v2073_v24, %v2073_v24  ;;  %v1799_v27 = vld [vmem:[#allocation2 + $0x274] ss:$8 sps:$4 sm:$0xff]  }
 0x1f5   :  { %v458_v29 = vpack.c.bf16 %v2075_v26, %v2075_v26  ;;  %v1797_v28 = vld [vmem:[#allocation2 + $0x270] ss:$8 sps:$4 sm:$0xff]  }
 0x1f7   :  { %1563 = vmatprep.mubr.msk.bf16.mxu1 %vm387_vm1, %v458_v29  ;;  %v1802_v29 = vld [vmem:[#allocation2 + $0x284] ss:$8 sps:$4 sm:$0xff]  }
 0x1f8   :  { %615 = vmatmul.mubr.bf16.vlgmr.msra.gmra.mrb[0].mxu1 %v457_v30  ;;  %v1800_v30 = vld [vmem:[#allocation2 + $0x280] ss:$8 sps:$4 sm:$0xff]  }
 0x1f9   :  { %1162 = vmatpush1.bf16.msra.mxu1 %v1788_v19  ;;  %v1842_v19 = vld [vmem:[#allocation2 + $0x360] ss:$8 sps:$4 sm:$0xff]  }
 0x1fa   :  { %1163 = vmatprep.subr.bf16.mxu1 %v1793_v21  ;;  %v1845_v21 = vld [vmem:[#allocation2 + $0x370] ss:$8 sps:$4 sm:$0xff]  }
 0x1fd   :  { %1164 = vmatpush1.bf16.msra.mxu1 %v1791_v22  ;;  %v1850_v22 = vld [vmem:[#allocation2 + $0x384] ss:$8 sps:$4 sm:$0xff]  }
 0x1fe   :  { %1165 = vmatprep.subr.bf16.mxu1 %v1796_v23  ;;  %v1848_v23 = vld [vmem:[#allocation2 + $0x380] ss:$8 sps:$4 sm:$0xff]  }
 0x201   :  { %1166 = vmatpush1.bf16.msra.mxu1 %v1794_v25  ;;  %v1853_v25 = vld [vmem:[#allocation2 + $0x394] ss:$8 sps:$4 sm:$0xff]  }
 0x202   :  { %1167 = vmatprep.subr.bf16.mxu1 %v1799_v27  ;;  %v1851_v27 = vld [vmem:[#allocation2 + $0x390] ss:$8 sps:$4 sm:$0xff]  }
 0x205   :  { %1168 = vmatpush1.bf16.msra.mxu1 %v1797_v28  ;;  %v1856_v28 = vld [vmem:[#allocation2 + $0x3a4] ss:$8 sps:$4 sm:$0xff]  }
 0x206   :  { %1169 = vmatprep.subr.bf16.mxu1 %v1802_v29  ;;  %v1854_v29 = vld [vmem:[#allocation2 + $0x3a0] ss:$8 sps:$4 sm:$0xff]  }
 0x209   :  { %1170 = vmatpush1.bf16.msra.mxu1 %v1800_v30  ;;  %v1859_v30 = vld [vmem:[#allocation2 + $0x3b4] ss:$8 sps:$4 sm:$0xff]  }
 0x2cb   :  { %v616_v31 = vpop.f32.mrb[0].mxu1 }
 0x2cc   :  { %v623_v32 = vmul.f32 0.2, %v616_v31  ;;  %v618_v33 = vpop.f32.mrb[1].mxu1  ;;  %vm622_vm2 = vcmp.ge.f32.partialorder %v616_v31, 0.0 }
 0x2cd   :  { %v619_v34 = vpop.f32.mrb[2].mxu1  ;;  %v1808_v33 = vld [vmem:[#allocation2 + $0x2a4] ss:$8 sps:$4 sm:$0xff]  }
 0x2ce   :  { %v620_v35 = vpop.f32.mrb[3].mxu1  ;;  %v624_v36 = vsel %vm622_vm2, %v616_v31, %v623_v32  ;;  %v1805_v31 = vld [vmem:[#allocation2 + $0x294] ss:$8 sps:$4 sm:$0xff]   ;;  %v1803_v32 = vld [vmem:[#allocation2 + $0x290] ss:$8 sps:$4 sm:$0xff]  }
 0x2cf   :  { %v626_v37 = vsel %vm625_vm3, %v624_v36, -inf  ;;  %1171 = vmatprep.subr.bf16.mxu1 %v1805_v31  ;;  %v1806_v34 = vld [vmem:[#allocation2 + $0x2a0] ss:$8 sps:$4 sm:$0xff]   ;;  %v1811_v35 = vld [vmem:[#allocation2 + $0x2b4] ss:$8 sps:$4 sm:$0xff]  }
 0x2d0   :  { %627 = vmax.xlane.f32.xlu0 %v626_v37  ;;  %1172 = vmatpush1.bf16.msra.mxu1 %v1803_v32  ;;  %v1814_v37 = vld [vmem:[#allocation2 + $0x2c4] ss:$8 sps:$4 sm:$0xff]   ;;  %v1857_v31 = vld [vmem:[#allocation2 + $0x3b0] ss:$8 sps:$4 sm:$0xff]   ;;  %v1032_v32 = vsub.s32 3, %v2056_v61 }
 0x2d1   :  { %1173 = vmatprep.subr.bf16.mxu1 %v1808_v33 }
 0x2d2   :  { %v1033_v33 = vrot.slane %v2059_v63, %v1032_v32 }
 0x2d4   :  { %1174 = vmatpush1.bf16.msra.mxu1 %v1806_v34  ;;  %v1037_v34 = vrot.slane %v2061_v0, %v1032_v32 }
 0x2d5   :  { %1175 = vmatprep.subr.bf16.mxu1 %v1811_v35 }
 0x35d   :  { %v628_v41 = vpop.xlane.xlu0 %627 }
 0x35e   :  { %v629_v42 = vsub.f32 %v624_v36, %v628_v41  ;;  %v1809_v36 = vld [vmem:[#allocation2 + $0x2b0] ss:$8 sps:$4 sm:$0xff]  }
 0x35f   :  { %1176 = vmatpush1.bf16.msra.mxu1 %v1809_v36  ;;  %v1815_v41 = vld [vmem:[#allocation2 + $0x2d0] ss:$8 sps:$4 sm:$0xff]  }
 0x360   :  { %v630_v43 = vmul.f32 1.442695, %v629_v42  ;;  %1177 = vmatprep.subr.bf16.mxu1 %v1814_v37 }
 0x362   :  { %1860 = vpow2.f32 %v630_v43 }
 0x363   :  { %1178 = vmatpush1.bf16.msra.mxu1 %v1812_v38 }
 0x364   :  { %1179 = vmatprep.subr.bf16.mxu1 %v1817_v40 }
 0x367   :  { %1180 = vmatpush1.bf16.msra.mxu1 %v1815_v41 }
 0x36c   :  { %v1861_v44 = vpop.eup %1860 }
 0x36d   :  { %1652 = vmatmul.mubr.msk.f32.vlgmr.msra.gmra.mrb[12].mxu0 %vm625_vm3, %v1861_v44 }
 0x36e   :  { %791 = vmatprep.mubr.f32.mxu0 %v1940_v39  ;;  %1567 = vmatpush1.msk.msra.mxu0 %vm637_vm4, %v716_v47 }
 0x36f   :  { %960 = vmatprep.subr.bf16.mxu0 %v1754_v48 }
 0x440   :  { %v707_v49 = vpop.f32.mrb[12].mxu0 }
 0x441   :  { %1862 = vrcp.f32 %v707_v49  ;;  %v1653_v50 = vpop.f32.mrb[13].mxu0  ;;  %v1233_v49 = vunpack.c.l.bf16 %v1232_v17  ;;  %v1839_v17 = vld [vmem:[#allocation2 + $0x350] ss:$8 sps:$4 sm:$0xff]  }
 0x44b   :  { %v1863_v51 = vpop.eup %1862 }
 0x44c   :  { %v2090_v53 = vmul.f32 %v1863_v51, %v1861_v44  ;;  %v1818_v51 = vld [vmem:[#allocation2 + $0x2e0] ss:$8 sps:$4 sm:$0xff]  }
 0x44e   :  { %1568 = vmatmul.mubr.msk.f32.vlgmr.msra.gmra.mrb[14].mxu0 %vm625_vm3, %v2090_v53 }
 0x44f   :  { %961 = vmatpush1.bf16.msra.mxu0 %v1752_v52  ;;  %v831_v52 = vsub.s32 2, %v2056_v61 }
 0x450   :  { %962 = vmatprep.subr.bf16.mxu0 %v1757_v54 }
 0x451   :  { %v832_v54 = vrot.slane %v2059_v63, %v831_v52 }
 0x453   :  { %963 = vmatpush1.bf16.msra.mxu0 %v1755_v55  ;;  %v836_v55 = vrot.slane %v2061_v0, %v831_v52 }
 0x454   :  { %964 = vmatprep.subr.bf16.mxu0 %v1760_v56 }
 0x457   :  { %965 = vmatpush1.bf16.msra.mxu0 %v1758_v57 }
 0x458   :  { %966 = vmatprep.subr.bf16.mxu0 %v1763_v58 }
 0x45b   :  { %967 = vmatpush1.bf16.msra.mxu0 %v1761_v59 }
 0x45c   :  { %968 = vmatprep.subr.bf16.mxu0 %v1766_v60 }
 0x45f   :  { %969 = vmatpush1.bf16.msra.mxu0 %v1764_v62 }
 0x460   :  { %970 = vmatprep.subr.bf16.mxu0 %v1769_v1 }
 0x463   :  { %971 = vmatpush1.bf16.msra.mxu0 %v1767_v2  ;;  %v1824_v2 = vld [vmem:[#allocation2 + $0x300] ss:$8 sps:$4 sm:$0xff]  }
 0x464   :  { %972 = vmatprep.subr.bf16.mxu0 %v1772_v3 }
 0x467   :  { %973 = vmatpush1.bf16.msra.mxu0 %v1770_v4  ;;  %v1829_v4 = vld [vmem:[#allocation2 + $0x314] ss:$8 sps:$4 sm:$0xff]  }
 0x468   :  { %974 = vmatprep.subr.bf16.mxu0 %v1775_v5 }
 0x46b   :  { %975 = vmatpush1.bf16.msra.mxu0 %v1773_v6 }
 0x46c   :  { %976 = vmatprep.subr.bf16.mxu0 %v1778_v7  ;;  %v1827_v7 = vld [vmem:[#allocation2 + $0x310] ss:$8 sps:$4 sm:$0xff]  }
 0x46f   :  { %977 = vmatpush1.bf16.msra.mxu0 %v1776_v8  ;;  %v1832_v8 = vld [vmem:[#allocation2 + $0x324] ss:$8 sps:$4 sm:$0xff]  }
 0x470   :  { %978 = vmatprep.subr.bf16.mxu0 %v1781_v9  ;;  %v1830_v9 = vld [vmem:[#allocation2 + $0x320] ss:$8 sps:$4 sm:$0xff]  }
 0x473   :  { %979 = vmatpush1.bf16.msra.mxu0 %v1779_v10  ;;  %v1835_v10 = vld [vmem:[#allocation2 + $0x334] ss:$8 sps:$4 sm:$0xff]  }
 0x474   :  { %980 = vmatprep.subr.bf16.mxu0 %v1784_v11  ;;  %v1833_v11 = vld [vmem:[#allocation2 + $0x330] ss:$8 sps:$4 sm:$0xff]  }
 0x477   :  { %981 = vmatpush1.bf16.msra.mxu0 %v1782_v12  ;;  %v1838_v12 = vld [vmem:[#allocation2 + $0x344] ss:$8 sps:$4 sm:$0xff]  }
 0x478   :  { %982 = vmatprep.subr.bf16.mxu0 %v1787_v15  ;;  %v1836_v15 = vld [vmem:[#allocation2 + $0x340] ss:$8 sps:$4 sm:$0xff]  }
 0x47b   :  { %983 = vmatpush1.bf16.msra.mxu0 %v1785_v16  ;;  %v1841_v16 = vld [vmem:[#allocation2 + $0x354] ss:$8 sps:$4 sm:$0xff]  }
 0x47c   :  { %1619 = vmatprep.subr.msk.mxu0 %vm637_vm4, %v1234_v18  ;;  %v1844_v18 = vld [vmem:[#allocation2 + $0x364] ss:$8 sps:$4 sm:$0xff]  }
 0x521   :  { %v793_v42 = vpop.f32.mrb[14].mxu0 }
 0x522   :  { %v798_v43 = vmul.f32 %v793_v42, %v2073_v24  ;;  %v795_v44 = vpop.f32.mrb[15].mxu0  ;;  %v1820_v24 = vld [vmem:[#allocation2 + $0x2e4] ss:$8 sps:$4 sm:$0xff]  }
 0x523   :  { %v799_v45 = vmul.f32 %v795_v44, %v2075_v26  ;;  %1181 = vmatprep.subr.bf16.mxu1 %v1820_v24  ;;  %v1821_v26 = vld [vmem:[#allocation2 + $0x2f0] ss:$8 sps:$4 sm:$0xff]  }
 0x524   :  { %v800_v46 = vadd.f32 %v798_v43, %v2066_v13  ;;  %1182 = vmatpush1.bf16.msra.mxu1 %v1818_v51  ;;  %v1823_v13 = vld [vmem:[#allocation2 + $0x2f4] ss:$8 sps:$4 sm:$0xff]  }
 0x525   :  { %v801_v47 = vadd.f32 %v799_v45, %v2068_v14  ;;  %1183 = vmatprep.subr.bf16.mxu1 %v1823_v13  ;;  %v1826_v14 = vld [vmem:[#allocation2 + $0x304] ss:$8 sps:$4 sm:$0xff]  }
 0x526   :  { %v827_v50 = vpack.c.bf16 %v800_v46, %v800_v46  ;;  %v1478_v46 = vsub.s32 4, %v2056_v61 }
 0x527   :  { %v828_v48 = vpack.c.bf16 %v801_v47, %v801_v47 }
 0x528   :  { %1184 = vmatpush1.bf16.msra.mxu1 %v1821_v26  ;;  %v1479_v47 = vrot.slane %v2059_v63, %v1478_v46 }
 0x529   :  { %1593 = vmatprep.mubr.msk.bf16.mxu0 %vm387_vm1, %v828_v48  ;;  %1435 = vmatprep.subr.bf16.mxu1 %v1826_v14 }
 0x52a   :  { %993 = vmatmul.mubr.bf16.vlgmr.msra.gmra.mrb[16].mxu0 %v827_v50 }
 0x52b   :  { %1620 = vmatpush1.msk.msra.mxu0 %vm637_vm4, %v1233_v49  ;;  %1305 = vmatprep.mubr.f32.mxu0 %v1940_v39  ;;  %v1483_v49 = vrot.slane %v2061_v0, %v1478_v46 }
 0x532   :  { %1621 = vmatmul.mubr.msk.f32.vlgmr.msra.gmra.mrb[20].mxu0 %vm625_vm3, %v2090_v53 }
 0x5fd   :  { %v994_v39 = vpop.f32.mrb[16].mxu0 }
 0x5fe   :  { %v995_v56 = vadd.f32 %v994_v39, %v832_v54  ;;  %v996_v57 = vpop.f32.mrb[17].mxu0 }
 0x5ff   :  { %v997_v53 = vadd.f32 %v996_v57, %v836_v55  ;;  %v998_v58 = vpop.f32.mrb[18].mxu0 }
 0x600   :  { %v1001_v59 = vmax.f32 %v995_v56, 0.0  ;;  %v999_v60 = vpop.f32.mrb[19].mxu0 }
 0x601   :  { %v1002_v62 = vmax.f32 %v997_v53, 0.0 }
 0x602   :  { %v1028_v3 = vpack.c.bf16 %v1001_v59, %v1001_v59 }
 0x603   :  { %v1029_v1 = vpack.c.bf16 %v1002_v62, %v1002_v62 }
 0x605   :  { %1618 = vmatprep.mubr.msk.bf16.mxu1 %vm387_vm1, %v1029_v1  ;;  %v2108_v5 = vpop.f32.mrb[20].mxu0 }
 0x606   :  { %1194 = vmatmul.mubr.bf16.vlgmr.msra.gmra.mrb[4].mxu1 %v1028_v3  ;;  %v2110_v6 = vpop.f32.mrb[21].mxu0 }
 0x607   :  { %1436 = vmatpush1.bf16.msra.mxu1 %v1824_v2 }
 0x608   :  { %1437 = vmatprep.subr.bf16.mxu1 %v1829_v4 }
 0x60b   :  { %1438 = vmatpush1.bf16.msra.mxu1 %v1827_v7 }
 0x60c   :  { %1439 = vmatprep.subr.bf16.mxu1 %v1832_v8 }
 0x60f   :  { %1440 = vmatpush1.bf16.msra.mxu1 %v1830_v9 }
 0x610   :  { %1441 = vmatprep.subr.bf16.mxu1 %v1835_v10 }
 0x613   :  { %1442 = vmatpush1.bf16.msra.mxu1 %v1833_v11 }
 0x614   :  { %1443 = vmatprep.subr.bf16.mxu1 %v1838_v12 }
 0x617   :  { %1444 = vmatpush1.bf16.msra.mxu1 %v1836_v15 }
 0x618   :  { %1445 = vmatprep.subr.bf16.mxu1 %v1841_v16 }
 0x61b   :  { %1446 = vmatpush1.bf16.msra.mxu1 %v1839_v17 }
 0x61c   :  { %1447 = vmatprep.subr.bf16.mxu1 %v1844_v18 }
 0x61f   :  { %1448 = vmatpush1.bf16.msra.mxu1 %v1842_v19 }
 0x620   :  { %1449 = vmatprep.subr.bf16.mxu1 %v1847_v20 }
 0x623   :  { %1450 = vmatpush1.bf16.msra.mxu1 %v1845_v21 }
 0x624   :  { %1451 = vmatprep.subr.bf16.mxu1 %v1850_v22 }
 0x627   :  { %1452 = vmatpush1.bf16.msra.mxu1 %v1848_v23 }
 0x628   :  { %1453 = vmatprep.subr.bf16.mxu1 %v1853_v25 }
 0x62b   :  { %1454 = vmatpush1.bf16.msra.mxu1 %v1851_v27 }
 0x62c   :  { %1455 = vmatprep.subr.bf16.mxu1 %v1856_v28 }
 0x62f   :  { %1456 = vmatpush1.bf16.msra.mxu1 %v1854_v29 }
 0x630   :  { %1457 = vmatprep.subr.bf16.mxu1 %v1859_v30 }
 0x633   :  { %1458 = vmatpush1.bf16.msra.mxu1 %v1857_v31 }
 0x6d9   :  { %v1195_v35 = vpop.f32.mrb[4].mxu1 }
 0x6da   :  { %v1196_v36 = vadd.f32 %v1195_v35, %v1033_v33  ;;  %v1197_v37 = vpop.f32.mrb[5].mxu1 }
 0x6db   :  { %v1198_v38 = vadd.f32 %v1197_v37, %v1037_v34  ;;  %v1199_v40 = vpop.f32.mrb[6].mxu1 }
 0x6dc   :  { %v1202_v41 = vmax.f32 %v1196_v36, 0.0  ;;  %v1200_v42 = vpop.f32.mrb[7].mxu1 }
 0x6dd   :  { %v1203_v43 = vmax.f32 %v1198_v38, 0.0 }
 0x6de   :  { %v1229_v45 = vpack.c.bf16 %v1202_v41, %v1202_v41 }
 0x6df   :  { %v1230_v44 = vpack.c.bf16 %v1203_v43, %v1203_v43 }
 0x6e1   :  { %1646 = vmatprep.mubr.msk.bf16.mxu1 %vm387_vm1, %v1230_v44 }
 0x6e2   :  { %1468 = vmatmul.mubr.bf16.vlgmr.msra.gmra.mrb[8].mxu1 %v1229_v45 }
 0x7b5   :  { %v1469_v48 = vpop.f32.mrb[8].mxu1 }
 0x7b6   :  { %v1470_v50 = vadd.f32 %v1469_v48, %v2108_v5  ;;  %v1471_v24 = vpop.f32.mrb[9].mxu1 }
 0x7b7   :  { %v1472_v51 = vadd.f32 %v1471_v24, %v2110_v6  ;;  %v1473_v13 = vpop.f32.mrb[10].mxu1 }
 0x7b8   :  { %v1484_v26 = vadd.f32 %v1479_v47, %v1470_v50  ;;  %v1474_v14 = vpop.f32.mrb[11].mxu1 }
 0x7b9   :  { %v1485_v52 = vadd.f32 %v1483_v49, %v1472_v51 }
 0x7ba   :  { %1486 = vst [vmem:[%s2133_s5] sm:$0xff] %v1484_v26 }
 0x7bb   :  { %1487 = vst.msk [vmem:[%s2133_s5 + $0x8] sm:$0xff] %vm387_vm1, %v1485_v52 }
 0x7bc   :  { %1492 = vsyncpa [#allocation3], 1 }
 0x7bd   :  { %1493 = vsyncpa [#allocation5], 1 }

</bundles_post_ra>
